<compile_context>
chip_gen: v7x
topology: tpu7x:2x2x1
jax: 0.10.0
libtpu: 0.0.40
codegen_flags: <defaults>
</compile_context>

<pallas_src>
import functools

import jax
import jax.numpy as jnp
import numpy as np
from jax import lax
from jax.experimental import pallas as pl
from jax.experimental.pallas import tpu as pltpu

LN_EPS = 1e-5  # torch.nn.LayerNorm default


def residual_kernel(x_ref, w_ref, b_ref, g_ref, beta_ref, o_ref):
    # x_ref: (TR, D) rows of the residual/sublayer input, in its native dtype.
    x = x_ref[...]

    # ---- sublayer: Linear(D -> D) on the MXU, f32 accumulation ----
    # Operands are fed in native dtype (bf16 fast path when inputs are bf16).
    s = jnp.dot(x, w_ref[...], preferred_element_type=jnp.float32)

    # ---- dropout (eval mode -> identity) + bias + residual add (f32) ----
    h = s + b_ref[...] + x.astype(jnp.float32)

    # ---- LayerNorm over the feature axis (f32 math; rsqrt -> EUP slot) ----
    mean = jnp.mean(h, axis=-1, keepdims=True)
    cen = h - mean
    var = jnp.mean(cen * cen, axis=-1, keepdims=True)
    y = cen * lax.rsqrt(var + LN_EPS)

    # fused affine epilogue: one broadcasted multiply-add pair
    o_ref[...] = (y * g_ref[...] + beta_ref[...]).astype(o_ref.dtype)


def _pick_row_tile(rows, requested):
    """Pick a large row tile (MXU fill / fewer grid steps), 16-row aligned
    (bf16 sublane packing; also fine for f32), keeping >= 2 grid steps when
    possible so the parallel row axis can shard across v7x's two TensorCores."""
    rt = max(1, min(requested, rows))
    if rows > 32 and rows <= rt:          # grid would collapse to 1 step
        rt = pl.cdiv(rows, 2)
    if rt >= 16:
        rt = (rt // 16) * 16
    else:
        rt = max(8, rt)
    return rt


@functools.partial(jax.jit, static_argnames=("row_tile",))
def residual_forward(x, w, b, gamma, beta, *, row_tile=256):
    """x: (B, S, D). Returns LayerNorm(x @ w + b + x), same shape/dtype as x."""
    B, S, D = x.shape
    rows = B * S
    rt = _pick_row_tile(rows, row_tile)
    rows_p = pl.cdiv(rows, rt) * rt

    x2 = x.reshape(rows, D)
    if rows_p != rows:                    # ragged last tile -> zero-pad rows
        x2 = jnp.pad(x2, ((0, rows_p - rows), (0, 0)))

    # VMEM budget: resident W (+ pipeline buffer) + double-buffered x/out
    # tiles + small param vectors; raise the scoped limit to fit big tiles.
    itm = jnp.dtype(x.dtype).itemsize
    vmem_need = (2 * D * D * jnp.dtype(w.dtype).itemsize
                 + 4 * rt * D * itm
                 + 8 * D * 4)
    vmem_limit = int(min(max(2 * vmem_need, 32 * 1024 * 1024),
                         60 * 1024 * 1024))

    out = pl.pallas_call(
        residual_kernel,
        out_shape=jax.ShapeDtypeStruct((rows_p, D), x.dtype),
        grid_spec=pltpu.PrefetchScalarGridSpec(
            num_scalar_prefetch=0,
            grid=(rows_p // rt,),
            in_specs=[
                pl.BlockSpec((rt, D), lambda i: (i, 0)),   # x rows
                pl.BlockSpec((D, D), lambda i: (0, 0)),    # W (resident)
                pl.BlockSpec((1, D), lambda i: (0, 0)),    # bias   (f32)
                pl.BlockSpec((1, D), lambda i: (0, 0)),    # LN gamma (f32)
                pl.BlockSpec((1, D), lambda i: (0, 0)),    # LN beta  (f32)
            ],
            out_specs=pl.BlockSpec((rt, D), lambda i: (i, 0)),
        ),
        compiler_params=pltpu.CompilerParams(
            dimension_semantics=("parallel",),
            vmem_limit_bytes=vmem_limit),
    )(x2, w, b, gamma, beta)

    if rows_p != rows:
        out = out[:rows]
    return out.reshape(B, S, D)


def _reference(x, w, b, gamma, beta):
    s = jnp.einsum("bsd,de->bse", x, w, preferred_element_type=jnp.float32)
    h = s + b[0] + x.astype(jnp.float32)
    mean = h.mean(-1, keepdims=True)
    var = ((h - mean) ** 2).mean(-1, keepdims=True)
    y = (h - mean) * lax.rsqrt(var + LN_EPS)
    return (y * gamma[0] + beta[0]).astype(x.dtype)


if __name__ == "__main__":
    # Small but perf-sane shapes: lane-dense D (multiple of 128) and enough
    # rows (B*S = 512) for two 256-row tiles -> 2 parallel grid steps.
    batch, seq, dim_model = 2, 256, 128
    dropout_p = 0.1  # unused: eval-mode dropout is identity

    key = jax.random.PRNGKey(0)
    kx, kw, kb = jax.random.split(key, 3)

    # bf16 activations + weights feed the MXU fast path; f32 LN/bias params.
    x = jax.random.normal(kx, (batch, seq, dim_model),
                          dtype=jnp.float32).astype(jnp.bfloat16)
    bound = 1.0 / np.sqrt(dim_model)   # PyTorch-style Linear init
    w = jax.random.uniform(kw, (dim_model, dim_model), minval=-bound,
                           maxval=bound, dtype=jnp.float32).astype(jnp.bfloat16)
    b = jax.random.uniform(kb, (1, dim_model), minval=-bound, maxval=bound,
                           dtype=jnp.float32)
    gamma = jnp.ones((1, dim_model), dtype=jnp.float32)   # LN default init
    beta = jnp.zeros((1, dim_model), dtype=jnp.float32)

    out = residual_forward(x, w, b, gamma, beta)
    out = jax.block_until_ready(out)

    ref = _reference(x, w, b, gamma, beta)
    assert out.shape == (batch, seq, dim_model)
    assert out.dtype == x.dtype
    out_f = np.asarray(out.astype(jnp.float32))
    ref_f = np.asarray(ref.astype(jnp.float32))
    np.testing.assert_allclose(out_f, ref_f, atol=2e-2, rtol=2e-2)
    print("KERNEL_OK")
</pallas_src>

<mosaic_0001>
module attributes {stable_mosaic.version = 11 : i64} {
  func.func @residual_kernel(%arg0: i32, %arg1: memref<256x128xbf16, #tpu.memory_space<vmem>>, %arg2: memref<128x128xbf16, #tpu.memory_space<vmem>>, %arg3: memref<1x128xf32, #tpu.memory_space<vmem>>, %arg4: memref<1x128xf32, #tpu.memory_space<vmem>>, %arg5: memref<1x128xf32, #tpu.memory_space<vmem>>, %arg6: memref<256x128xbf16, #tpu.memory_space<vmem>>) attributes {dimension_semantics = [#tpu.dimension_semantics<parallel>], iteration_bounds = array<i64: 2>, scalar_prefetch = 0 : i64, scratch_operands = 0 : i64, tpu.core_type = #tpu.core_type<tc>, window_params = [{transform_indices = @transform_0, window_bounds = array<i64: 256, 128>}, {pipeline_mode = #tpu.pipeline_mode<synchronous>, transform_indices = @transform_1, window_bounds = array<i64: 128, 128>}, {pipeline_mode = #tpu.pipeline_mode<synchronous>, transform_indices = @transform_2, window_bounds = array<i64: 1, 128>}, {pipeline_mode = #tpu.pipeline_mode<synchronous>, transform_indices = @transform_3, window_bounds = array<i64: 1, 128>}, {pipeline_mode = #tpu.pipeline_mode<synchronous>, transform_indices = @transform_4, window_bounds = array<i64: 1, 128>}, {transform_indices = @transform_5, window_bounds = array<i64: 256, 128>}]} {
    %c0 = arith.constant 0 : index
    %c0_0 = arith.constant 0 : index
    %0 = vector.load %arg1[%c0, %c0_0] : memref<256x128xbf16, #tpu.memory_space<vmem>>, vector<256x128xbf16>
    %c0_1 = arith.constant 0 : index
    %c0_2 = arith.constant 0 : index
    %1 = vector.load %arg2[%c0_1, %c0_2] : memref<128x128xbf16, #tpu.memory_space<vmem>>, vector<128x128xbf16>
    %cst = arith.constant dense<0.000000e+00> : vector<256x128xf32>
    %2 = tpu.matmul %0, %1, %cst {dimension_numbers = #tpu.dot_dimension_numbers<[1], [0], [0], [1], [0, 0, 1, 1], [], []>} : vector<256x128xbf16>, vector<128x128xbf16>, vector<256x128xf32> -> vector<256x128xf32>
    %c0_3 = arith.constant 0 : index
    %c0_4 = arith.constant 0 : index
    %3 = vector.load %arg3[%c0_3, %c0_4] : memref<1x128xf32, #tpu.memory_space<vmem>>, vector<1x128xf32>
    %4 = vector.broadcast %3 : vector<1x128xf32> to vector<256x128xf32>
    %5 = arith.addf %2, %4 : vector<256x128xf32>
    %6 = arith.extf %0 : vector<256x128xbf16> to vector<256x128xf32>
    %7 = arith.addf %5, %6 : vector<256x128xf32>
    %cst_5 = arith.constant dense<0.000000e+00> : vector<256xf32>
    %8 = vector.multi_reduction <add>, %7, %cst_5 [1] : vector<256x128xf32> to vector<256xf32>
    %9 = vector.shape_cast %8 : vector<256xf32> to vector<256x1xf32>
    %cst_6 = arith.constant 1.280000e+02 : f32
    %10 = vector.broadcast %cst_6 : f32 to vector<256x1xf32>
    %11 = arith.divf %9, %10 : vector<256x1xf32>
    %12 = vector.broadcast %11 : vector<256x1xf32> to vector<256x128xf32>
    %13 = arith.subf %7, %12 : vector<256x128xf32>
    %14 = arith.mulf %13, %13 : vector<256x128xf32>
    %cst_7 = arith.constant dense<0.000000e+00> : vector<256xf32>
    %15 = vector.multi_reduction <add>, %14, %cst_7 [1] : vector<256x128xf32> to vector<256xf32>
    %16 = vector.shape_cast %15 : vector<256xf32> to vector<256x1xf32>
    %cst_8 = arith.constant 1.280000e+02 : f32
    %17 = vector.broadcast %cst_8 : f32 to vector<256x1xf32>
    %18 = arith.divf %16, %17 : vector<256x1xf32>
    %cst_9 = arith.constant 9.99999974E-6 : f32
    %19 = vector.broadcast %cst_9 : f32 to vector<256x1xf32>
    %20 = arith.addf %18, %19 : vector<256x1xf32>
    %21 = math.rsqrt %20 : vector<256x1xf32>
    %22 = vector.broadcast %21 : vector<256x1xf32> to vector<256x128xf32>
    %23 = arith.mulf %13, %22 : vector<256x128xf32>
    %c0_10 = arith.constant 0 : index
    %c0_11 = arith.constant 0 : index
    %24 = vector.load %arg4[%c0_10, %c0_11] : memref<1x128xf32, #tpu.memory_space<vmem>>, vector<1x128xf32>
    %25 = vector.broadcast %24 : vector<1x128xf32> to vector<256x128xf32>
    %26 = arith.mulf %23, %25 : vector<256x128xf32>
    %c0_12 = arith.constant 0 : index
    %c0_13 = arith.constant 0 : index
    %27 = vector.load %arg5[%c0_12, %c0_13] : memref<1x128xf32, #tpu.memory_space<vmem>>, vector<1x128xf32>
    %28 = vector.broadcast %27 : vector<1x128xf32> to vector<256x128xf32>
    %29 = arith.addf %26, %28 : vector<256x128xf32>
    %30 = arith.truncf %29 : vector<256x128xf32> to vector<256x128xbf16>
    %c0_14 = arith.constant 0 : index
    %c0_15 = arith.constant 0 : index
    %31 = vector.load %arg6[%c0_14, %c0_15] : memref<256x128xbf16, #tpu.memory_space<vmem>>, vector<256x128xbf16>
    tpu.vector_store %arg6[%c0_14, %c0_15], %30 {strides = array<i32>} : memref<256x128xbf16, #tpu.memory_space<vmem>>, vector<256x128xbf16>,
    return
  }
  func.func @transform_0(%arg0: i32) -> (i32, i32) {
    %c0_i32 = arith.constant 0 : i32
    %c0_i32_0 = arith.constant 0 : i32
    return %arg0, %c0_i32 : i32, i32
  }
  func.func @transform_1(%arg0: i32) -> (i32, i32) {
    %c0_i32 = arith.constant 0 : i32
    %c0_i32_0 = arith.constant 0 : i32
    %c0_i32_1 = arith.constant 0 : i32
    return %c0_i32, %c0_i32_0 : i32, i32
  }
  func.func @transform_2(%arg0: i32) -> (i32, i32) {
    %c0_i32 = arith.constant 0 : i32
    %c0_i32_0 = arith.constant 0 : i32
    %c0_i32_1 = arith.constant 0 : i32
    return %c0_i32, %c0_i32_0 : i32, i32
  }
  func.func @transform_3(%arg0: i32) -> (i32, i32) {
    %c0_i32 = arith.constant 0 : i32
    %c0_i32_0 = arith.constant 0 : i32
    %c0_i32_1 = arith.constant 0 : i32
    return %c0_i32, %c0_i32_0 : i32, i32
  }
  func.func @transform_4(%arg0: i32) -> (i32, i32) {
    %c0_i32 = arith.constant 0 : i32
    %c0_i32_0 = arith.constant 0 : i32
    %c0_i32_1 = arith.constant 0 : i32
    return %c0_i32, %c0_i32_0 : i32, i32
  }
  func.func @transform_5(%arg0: i32) -> (i32, i32) {
    %c0_i32 = arith.constant 0 : i32
    %c0_i32_0 = arith.constant 0 : i32
    return %arg0, %c0_i32 : i32, i32
  }
}

</mosaic_0001>

<bundles_post_ra>
// kernel: residual_forward.1
= control target key start
LH: loop header
LB: loop body
LE: loop exit
PB: predicated region body
PF: predicated region fallthrough
CT: control target
= control target key end

     0   :  { %10 = vsyncpa [#allocation3], 0  ;;  %s2730_s0 = inlined_call_operand.hbm [shape: bf16[512,128], index: 0, kind: input, shape index: {}]   ;;  %s2731_s1 = inlined_call_operand.hbm [shape: bf16[128,128], index: 1, kind: input, shape index: {}]   ;;  %s2732_s2 = inlined_call_operand.vmem [shape: f32[1,128], index: 2, kind: input, shape index: {}]   ;;  %s2733_s3 = inlined_call_operand.vmem [shape: f32[1,128], index: 3, kind: input, shape index: {}]   ;;  %s2734_s4 = inlined_call_operand.vmem [shape: f32[1,128], index: 4, kind: input, shape index: {}]   ;;  %s2735_s5 = inlined_call_operand.hbm [shape: bf16[512,128], index: 5, kind: output, shape index: {}]  }
   0x1   :  { %12 = vsyncpa [#allocation3 + $0x1], 0 }
   0x2   :  { %13 = vsyncpa [#allocation6], 0 }
   0x3   :  { %14 = vsyncpa [#allocation4], 0 }
   0x4   :  { %16 = vsyncpa [#allocation4 + $0x1], 0  ;;  %s1997_s18 = smov 0   ;;  %s1999_s19 = smov 0  }
   0x5   :  { %s2001_s20 = smov 0   ;;  %s2003_s21 = smov 0  }
   0x6 LB: > { %s2018_s22 = sadd.s32 4294967295, %s1958_s21   ;;  %s1373_s23 = sadd.s32 4294967294, %s1958_s21   ;;  %s1958_s21 = sphi %s2003_s21, %s2755_s21   ;;  %s1954_s20 = sphi %s2001_s20, %s2754_s20   ;;  %s1950_s19 = sphi %s1999_s19, %s2753_s19   ;;  %s1946_s18 = sphi %s1997_s18, %s2752_s18  }
   0x7   : > { %p42_p0 = scmp.ne.s32.totalorder %s1950_s19, %s1946_s18  ;;  %p2736_p1 = scmp.eq.s32.totalorder %s2018_s22, 0 }
   0x8   : > { %p156_p3 = scmp.eq.s32.totalorder %s1373_s23, 1  ;;  %p1374_p5 = scmp.ge.s32.totalorder %s1958_s21, 1 }
   0x9   : > { %p2027_p4 = por %p2736_p1, %p42_p0  ;;  %p163_p7 = scmp.lt.s32.totalorder %s1958_s21, 3 }
   0xa   : > { %p2032_p6 = por %p156_p3, %p42_p0  ;;  %s1960_s27 = smov [#allocation5]  }
   0xb   : > { %s2739_s24 = scalar_select %p2027_p4, 1, 0 }
   0xc   : > { %s2740_s25 = scalar_select %p2032_p6, 1, 0 }
   0xd   : > { %p2037_p8 = pnand %p1374_p5, %p163_p7  ;;  %s175_s28 = sshll.u32 %s1960_s27, 4  ;;  %s2041_s28 = int_to_ptr.vmem [resolvable:$true] %s175_s28 }
   0xe   : > { %s2053_s30 = sadd.s32 1, %s1958_s21   ;;  %s29_s6 = sadd.s32 1, %s1954_s20 }
   0xf   : > { %s2741_s26 = scalar_select %p2037_p8, 1, 0 }
  0x10   : > { %p1673_p9 = pneg %p2037_p8  ;;  %s26_s7 = ssub.s32 %s1958_s21, %s2053_s30 }
  0x11   : > { %s1830_s10 = scalar_lea.hbm %s2731_s1, 1024 }
  0x12   : > { %p2048_p11 = pnand %p1673_p9, %p2736_p1  ;;  %p1831_p12 = scmp.ne.s32.totalorder %s2731_s1, %s1830_s10 }
  0x13   : > { %p1837_p5 = scmp.lt.u32.totalorder %s1830_s10, %s2731_s1 }
  0x14   : > { %p1832_p13 = pneg %p2048_p11 }
  0x16   : > { %p1833_p0 = pnand %p1832_p13, %p1831_p12 }
  0x18   : > { %p1834_p3 = pneg %p1833_p0 }
  0x1a   : > { %p1839_p7 = pnand %p1837_p5, %p1834_p3 }
  0x1c   : > { %1842 = shalt.err (!%p1839_p7)
}
  0x1d   : > { %s1843_s15 = scalar_lea.vmem %s2041_s28, 1024  ;;  %p1851_p2 = scmp.lt.s32.totalorder %s2041_s28, %s2041_s28 }
  0x1e   : > { %p1844_p9 = scmp.ne.s32.totalorder %s2041_s28, %s1843_s15  ;;  %p1852_p6 = scmp.lt.s32.totalorder %s1843_s15, %s1843_s15 }
  0x20   : > { %p1846_p10 = pnand %p1844_p9, %p1832_p13  ;;  %p1853_p4 = por %p1852_p6, %p1851_p2 }
  0x22   : > { %p1847_p1 = pneg %p1846_p10 }
  0x24   : > { %p1854_p8 = pnand %p1853_p4, %p1847_p1 }
  0x26   : > { %1857 = shalt.err (!%p1854_p8)
}
  0x27   : > { %s1961_s16 = smov 64   ;;  %s1962_s17 = smov 4  }
  0x28   : > { %1676 = dma.hbm_to_vmem [thread:$0]  (!%p2048_p11), %s2731_s1, 1024, %s2041_s28, [#allocation6], %s1961_s16, %s1961_s16, %s1962_s17  }
  0x29   : > { %p27_p1 = scmp.eq.s32.totalorder %s26_s7, 0  ;;  %p36_p2 = scmp.ne.s32.totalorder %s1954_s20, %s1950_s19 }
  0x2a   : > { %p37_p4 = scmp.eq.s32.totalorder %s1958_s21, 0  ;;  %p1686_p6 = scmp.lt.s32.totalorder %s1958_s21, 2 }
  0x2b   : > { %s2087_s8 = scalar_select %p27_p1, %s1954_s20, %s29_s6  }
  0x2c   : > { %p38_p8 = por %p37_p4, %p36_p2  ;;  %p2743_p10 = scmp.eq.s32.totalorder %s2018_s22, 1 }
  0x2d   : > { %s198_s29 = sand.u32 1, %s1954_s20   ;;  %s1448_s10 = sshll.u32 %s1958_s21, 11 }
  0x2e   : > { %p2091_p12 = por %p2743_p10, %p36_p2  ;;  %s1377_s11 = sshll.u32 %s198_s29, 7 }
  0x2f   : > { %s2100_s14 = scalar_lea.hbm %s2730_s0, %s1448_s10  ;;  %s202_s28 = scalar_lea.vmem [#allocation2], %s1377_s11 }
  0x30   : > { %s209_s6 = sshll.u32 %s202_s28, 4  ;;  %p2102_p11 = pnand %p1686_p6, %p38_p8  ;;  %s2106_s6 = int_to_ptr.vmem [resolvable:$true] %s209_s6 }
  0x31   : > { %s2108_s15 = scalar_lea.sflag [#allocation3], %s198_s29  ;;  %s1858_s23 = scalar_lea.hbm %s2100_s14, 2048 }
  0x32   : > { %p1859_p13 = scmp.ne.s32.totalorder %s2100_s14, %s1858_s23  ;;  %p1860_p0 = pneg %p2102_p11 }
  0x33   : > { %s1863_s11 = scalar_lea.hbm %s2730_s0, 4096  ;;  %p1864_p7 = scmp.lt.u32.totalorder %s2100_s14, %s2730_s0 }
  0x34   : > { %p1861_p3 = pnand %p1860_p0, %p1859_p13  ;;  %p1865_p9 = scmp.lt.u32.totalorder %s1863_s11, %s1858_s23 }
  0x35   : > { %p1867_p2 = scmp.lt.u32.totalorder %s1858_s23, %s2100_s14 }
  0x36   : > { %p1862_p5 = pneg %p1861_p3  ;;  %p1866_p1 = por %p1865_p9, %p1864_p7 }
  0x38   : > { %p1868_p4 = por %p1867_p2, %p1866_p1 }
  0x3a   : > { %p1869_p6 = pnand %p1868_p4, %p1862_p5 }
  0x3c   : > { %1872 = shalt.err (!%p1869_p6)
}
  0x3d   : > { %s1873_s29 = scalar_lea.vmem %s2106_s6, 2048  ;;  %s1963_s28 = smov [#allocation2]  }
  0x3e   : > { %p1874_p8 = scmp.ne.s32.totalorder %s2106_s6, %s1873_s29  ;;  %s1878_s27 = sshll.u32 %s1963_s28, 4  ;;  %s1879_s27 = int_to_ptr.vmem [resolvable:$false] %s1878_s27 }
  0x3f   : > { %s1880_s10 = scalar_lea.vmem %s1879_s27, 4096  ;;  %p1881_p3 = scmp.lt.s32.totalorder %s2106_s6, %s1879_s27 }
  0x40   : > { %p1876_p10 = pnand %p1874_p8, %p1860_p0  ;;  %p1882_p7 = scmp.lt.s32.totalorder %s1880_s10, %s1873_s29 }
  0x42   : > { %p1877_p13 = pneg %p1876_p10  ;;  %p1883_p9 = por %p1882_p7, %p1881_p3 }
  0x44   : > { %p1884_p1 = pnand %p1883_p9, %p1877_p13 }
  0x46   : > { %1887 = shalt.err (!%p1884_p1)
}
  0x47   : > { %1680 = dma.hbm_to_vmem [thread:$0]  (!%p2102_p11), %s2100_s14, 2048, %s2106_s6, %s2108_s15, %s1961_s16, %s1961_s16, %s1962_s17  }
  0x48   : > { %p2746_p0 = scmp.ne.s32.totalorder %s2741_s26, 0 }
  0x49   : > { %s2142_s23 = sand.u32 (!%p2746_p0), 1, %s1950_s19   ;;  %p2747_p5 = scmp.ne.s32.totalorder (!%p2746_p0), %s2739_s24, 0 }
  0x4a   : > { %221 = sbr.rel (%p2746_p0) target bundleno = 726 (0x2d6), region = 40  ;;  %s1381_s11 = sshll.u32 (!%p2746_p0), %s2142_s23, 7 }
  0x4b   : > { %s224_s12 = scalar_lea.sflag (!%p2746_p0), [#allocation3], %s2142_s23  ;;  %s2148_s7 = scalar_lea.vmem (!%p2746_p0), [#allocation2], %s1381_s11 }
  0x51   : > { %1933 = dma.done.wait (%p2747_p5), %s224_s12, 2048  }
  0x52   : > { %1935 = vsyncadd (%p2747_p5), %s224_s12, 4294965248  ;;  %p2748_p11 = scmp.eq.s32.totalorder %s2018_s22, 0 }
  0x54   : > { %1937 = dma.done.wait (%p2748_p11), [#allocation6], 1024   ;;  %p2749_p2 = pmov %p2748_p11 }
  0x55   : > { %v1726_v0 = vld [vmem:[#allocation5] sm:$0xff]   ;;  %v1727_v1 = vld [vmem:[#allocation5 + $0x8] sm:$0xff]   ;;  %v1728_v2 = vld [vmem:[#allocation5 + $0x10] sm:$0xff]   ;;  %s2577_s15 = scalar_lea.vmem [#allocation7], %s1381_s11  ;;  %s1481_s13 = sshll.u32 %s2018_s22, 11 }
  0x56   : > { %1939 = vsyncadd (%p2749_p2), [#allocation6], 4294966272  ;;  %1601 = vmatprep.subr.bf16.mxu0 %v1726_v0  ;;  %1649 = vmatprep.subr.bf16.mxu1 %v1726_v0  ;;  %v1729_v3 = vld [vmem:[#allocation5 + $0x18] sm:$0xff]   ;;  %v2159_v4 = vld [vmem:[%s2148_s7] sm:$0xff]   ;;  %s1290_s29 = sshll.u32 %s2577_s15, 4  ;;  %s2683_s10 = scalar_lea.hbm %s2735_s5, %s1481_s13  ;;  %s2685_s29 = int_to_ptr.vmem [resolvable:$true] %s1290_s29 }
  0x57   : > { %1602 = vmatpush3.bf16.msra.mxu0 %v1726_v0  ;;  %1657 = vmatpush3.bf16.msra.mxu1 %v1726_v0  ;;  %v2162_v5 = vld [vmem:[%s2148_s7 + $0x40] sm:$0xff]   ;;  %v1731_v7 = vld [vmem:[#allocation5 + $0x28] sm:$0xff]   ;;  %v1732_v8 = vld [vmem:[#allocation5 + $0x30] sm:$0xff]   ;;  %v621_v27 = vunpack.c.l.bf16 %v2159_v4  ;;  %v622_v35 = vunpack.c.h.bf16 %v2159_v4  ;;  %s1277_s11 = scalar_lea.sflag [#allocation4], %s2142_s23  ;;  %s1888_s22 = scalar_lea.vmem %s2685_s29, 2048 }
  0x58   : > { %1603 = vmatprep.subr.bf16.mxu0 %v1727_v1  ;;  %1650 = vmatprep.subr.bf16.mxu1 %v1727_v1  ;;  %v1730_v6 = vld [vmem:[#allocation5 + $0x20] sm:$0xff]   ;;  %v1733_v9 = vld [vmem:[#allocation5 + $0x38] sm:$0xff]   ;;  %v2167_v10 = vld [vmem:[%s2148_s7 + $0x8] sm:$0xff]   ;;  %v637_v28 = vunpack.c.l.bf16 %v2162_v5  ;;  %v638_v36 = vunpack.c.h.bf16 %v2162_v5  ;;  %p1889_p4 = scmp.ne.s32.totalorder %s2685_s29, %s1888_s22  ;;  %s1964_s12 = smov [#allocation7]  }
  0x59   : > { %1617 = vmatprep.mubr.bf16.mxu0 %v2159_v4  ;;  %1633 = vmatprep.mubr.bf16.mxu1 %v2162_v5  ;;  %v2170_v11 = vld [vmem:[%s2148_s7 + $0x48] sm:$0xff]   ;;  %v2173_v12 = vld [vmem:[%s2148_s7 + $0x10] sm:$0xff]   ;;  %v2182_v14 = vld [vmem:[%s2148_s7 + $0x18] sm:$0xff]   ;;  %v623_v26 = vunpack.c.l.bf16 %v2167_v10  ;;  %v624_v46 = vunpack.c.h.bf16 %v2167_v10 }
  0x5a   : > { %v2176_v13 = vld [vmem:[%s2148_s7 + $0x50] sm:$0xff]   ;;  %v2186_v15 = vld [vmem:[%s2148_s7 + $0x58] sm:$0xff]   ;;  %v2189_v16 = vld [vmem:[%s2148_s7 + $0x20] sm:$0xff]   ;;  %v639_v25 = vunpack.c.l.bf16 %v2170_v11  ;;  %v640_v55 = vunpack.c.h.bf16 %v2170_v11  ;;  %v627_v4 = vunpack.c.l.bf16 %v2182_v14  ;;  %p1890_p6 = pnand %p1889_p4, %p2091_p12 }
  0x5b   : > { %1604 = vmatpush3.bf16.msra.mxu0 %v1727_v1  ;;  %1658 = vmatpush3.bf16.msra.mxu1 %v1727_v1  ;;  %v2192_v17 = vld [vmem:[%s2148_s7 + $0x60] sm:$0xff]   ;;  %v2198_v18 = vld [vmem:[%s2148_s7 + $0x28] sm:$0xff]   ;;  %v2205_v20 = vld [vmem:[%s2148_s7 + $0x30] sm:$0xff]  }
  0x5c   : > { %1605 = vmatprep.subr.bf16.mxu0 %v1728_v2  ;;  %1651 = vmatprep.subr.bf16.mxu1 %v1728_v2  ;;  %v2202_v19 = vld [vmem:[%s2148_s7 + $0x68] sm:$0xff]   ;;  %v2208_v21 = vld [vmem:[%s2148_s7 + $0x70] sm:$0xff]   ;;  %v2214_v22 = vld [vmem:[%s2148_s7 + $0x38] sm:$0xff]   ;;  %p1891_p8 = pneg %p1890_p6 }
  0x5d   : > { %v2218_v23 = vld [vmem:[%s2148_s7 + $0x78] sm:$0xff]   ;;  %v2225_v24 = vld [vmem:[%s2732_s2] ss:$0 sm:$0xff]  ;;  %s1892_s7 = sshll.u32 %s1964_s12, 4  ;;  %s1893_s7 = int_to_ptr.vmem [resolvable:$false] %s1892_s7 }
  0x5e   : > { %s1894_s24 = scalar_lea.vmem %s1893_s7, 4096  ;;  %p1895_p10 = scmp.lt.s32.totalorder %s2685_s29, %s1893_s7 }
  0x5f   : > { %1606 = vmatpush3.bf16.msra.mxu0 %v1728_v2  ;;  %1659 = vmatpush3.bf16.msra.mxu1 %v1728_v2  ;;  %p1896_p13 = scmp.lt.s32.totalorder %s1894_s24, %s1888_s22 }
  0x60   : > { %1607 = vmatprep.subr.bf16.mxu0 %v1729_v3  ;;  %1652 = vmatprep.subr.bf16.mxu1 %v1729_v3 }
  0x61   : > { %p1897_p3 = por %p1896_p13, %p1895_p10 }
  0x63   : > { %1608 = vmatpush3.bf16.msra.mxu0 %v1729_v3  ;;  %1660 = vmatpush3.bf16.msra.mxu1 %v1729_v3  ;;  %v628_v3 = vunpack.c.h.bf16 %v2182_v14  ;;  %p1898_p7 = pnand %p1897_p3, %p1891_p8 }
  0x64   : > { %1609 = vmatprep.subr.bf16.mxu0 %v1730_v6  ;;  %1653 = vmatprep.subr.bf16.mxu1 %v1730_v6 }
  0x67   : > { %1610 = vmatpush3.bf16.msra.mxu0 %v1730_v6  ;;  %1661 = vmatpush3.bf16.msra.mxu1 %v1730_v6  ;;  %v644_v6 = vunpack.c.h.bf16 %v2186_v15 }
  0x68   : > { %1611 = vmatprep.subr.bf16.mxu0 %v1731_v7  ;;  %1654 = vmatprep.subr.bf16.mxu1 %v1731_v7 }
  0x6b   : > { %1612 = vmatpush3.bf16.msra.mxu0 %v1731_v7  ;;  %1662 = vmatpush3.bf16.msra.mxu1 %v1731_v7 }
  0x6c   : > { %1613 = vmatprep.subr.bf16.mxu0 %v1732_v8  ;;  %1655 = vmatprep.subr.bf16.mxu1 %v1732_v8 }
  0x6f   : > { %1614 = vmatpush3.bf16.msra.mxu0 %v1732_v8  ;;  %1663 = vmatpush3.bf16.msra.mxu1 %v1732_v8 }
  0x70   : > { %1615 = vmatprep.subr.bf16.mxu0 %v1733_v9  ;;  %1656 = vmatprep.subr.bf16.mxu1 %v1733_v9 }
  0x73   : > { %1616 = vmatpush3.bf16.msra.mxu0 %v1733_v9  ;;  %1664 = vmatpush3.bf16.msra.mxu1 %v1733_v9 }
  0x76   : > { %1618 = vmatmul.mubr.bf16.vlgmr.msra.gmra.mrb[0].mxu0 %v2167_v10  ;;  %1634 = vmatmul.mubr.bf16.vlgmr.msra.gmra.mrb[0].mxu1 %v2170_v11 }
  0x77   : > { %1621 = vmatprep.mubr.bf16.mxu0 %v2173_v12  ;;  %1637 = vmatprep.mubr.bf16.mxu1 %v2176_v13 }
  0x7e   : > { %1622 = vmatmul.mubr.bf16.gmra.mrb[4].mxu0 %v2182_v14  ;;  %1638 = vmatmul.mubr.bf16.gmra.mrb[4].mxu1 %v2186_v15 }
  0x7f   : > { %1625 = vmatprep.mubr.bf16.mxu0 %v2189_v16  ;;  %1641 = vmatprep.mubr.bf16.mxu1 %v2192_v17 }
  0x86   : > { %1626 = vmatmul.mubr.bf16.gmra.mrb[8].mxu0 %v2198_v18  ;;  %1642 = vmatmul.mubr.bf16.gmra.mrb[8].mxu1 %v2202_v19 }
  0x87   : > { %1629 = vmatprep.mubr.bf16.mxu0 %v2205_v20  ;;  %1645 = vmatprep.mubr.bf16.mxu1 %v2208_v21 }
  0x8e   : > { %1630 = vmatmul.mubr.bf16.gmra.mrb[12].mxu0 %v2214_v22  ;;  %1646 = vmatmul.mubr.bf16.gmra.mrb[12].mxu1 %v2218_v23 }
 0x149   : > { %v1619_v29 = vpop.f32.mrb[0].mxu0  ;;  %v1635_v30 = vpop.f32.mrb[0].mxu1 }
 0x14a   : > { %v503_v31 = vadd.f32 %v1619_v29, %v2225_v24  ;;  %v567_v32 = vadd.f32 %v1635_v30, %v2225_v24  ;;  %v494_v33 = vpop.f32.mrb[1].mxu0  ;;  %v558_v34 = vpop.f32.mrb[1].mxu1 }
 0x14b   : > { %v495_v37 = vadd.f32 %v2225_v24, %v494_v33  ;;  %v559_v38 = vadd.f32 %v2225_v24, %v558_v34  ;;  %v1620_v39 = vpop.f32.mrb[2].mxu0  ;;  %v1636_v40 = vpop.f32.mrb[2].mxu1 }
 0x14c   : > { %v506_v41 = vadd.f32 %v1620_v39, %v2225_v24  ;;  %v497_v42 = vpop.f32.mrb[3].mxu0  ;;  %v561_v43 = vpop.f32.mrb[3].mxu1  ;;  %v2238_v44 = vadd.f32 %v639_v25, %v567_v32  ;;  %v2240_v45 = vadd.f32 %v623_v26, %v503_v31  ;;  %v570_v53 = vadd.f32 %v1636_v40, %v2225_v24 }
 0x14d   : > { %v498_v47 = vadd.f32 %v2225_v24, %v497_v42  ;;  %v562_v48 = vadd.f32 %v2225_v24, %v561_v43  ;;  %v2245_v49 = vadd.f32 %v621_v27, %v495_v37  ;;  %v2247_v50 = vadd.f32 %v637_v28, %v559_v38 }
 0x14e   : > { %721 = vadd.xlane.f32.xlu0 %v2238_v44  ;;  %689 = vadd.xlane.f32.xlu1 %v2240_v45  ;;  %v2256_v54 = vadd.f32 %v624_v46, %v506_v41  ;;  %v2261_v62 = vadd.f32 %v640_v55, %v570_v53  ;;  %v643_v25 = vunpack.c.l.bf16 %v2186_v15  ;;  %v626_v15 = vunpack.c.h.bf16 %v2173_v12 }
 0x14f   : > { %v2251_v51 = vadd.f32 %v638_v36, %v562_v48  ;;  %v2253_v52 = vadd.f32 %v622_v35, %v498_v47  ;;  %v625_v35 = vunpack.c.l.bf16 %v2173_v12  ;;  %v642_v40 = vunpack.c.h.bf16 %v2176_v13 }
 0x150   : > { %v641_v41 = vunpack.c.l.bf16 %v2176_v13 }
 0x151   : > { %v1623_v56 = vpop.f32.mrb[4].mxu0  ;;  %v1639_v57 = vpop.f32.mrb[4].mxu1 }
 0x152   : > { %691 = vadd.xlane.f32.xlu1 %v2256_v54  ;;  %685 = vadd.xlane.f32.xlu0 %v2245_v49  ;;  %v510_v58 = vpop.f32.mrb[5].mxu0  ;;  %v574_v59 = vpop.f32.mrb[5].mxu1  ;;  %v519_v1 = vadd.f32 %v1623_v56, %v2225_v24  ;;  %v583_v5 = vadd.f32 %v1639_v57, %v2225_v24  ;;  %v632_v57 = vunpack.c.h.bf16 %v2198_v18 }
 0x153   : > { %v1624_v60 = vpop.f32.mrb[6].mxu0  ;;  %v1640_v61 = vpop.f32.mrb[6].mxu1  ;;  %v511_v33 = vadd.f32 %v2225_v24, %v510_v58  ;;  %v575_v46 = vadd.f32 %v2225_v24, %v574_v59  ;;  %v631_v58 = vunpack.c.l.bf16 %v2198_v18  ;;  %v647_v18 = vunpack.c.l.bf16 %v2202_v19 }
 0x154   : > { %v513_v63 = vpop.f32.mrb[7].mxu0  ;;  %v577_v0 = vpop.f32.mrb[7].mxu1  ;;  %v522_v2 = vadd.f32 %v1624_v60, %v2225_v24  ;;  %v586_v9 = vadd.f32 %v1640_v61, %v2225_v24  ;;  %v2276_v11 = vadd.f32 %v627_v4, %v519_v1  ;;  %v2283_v32 = vadd.f32 %v643_v25, %v583_v5 }
 0x155   : > { %v514_v34 = vadd.f32 %v2225_v24, %v513_v63  ;;  %v578_v12 = vadd.f32 %v2225_v24, %v577_v0  ;;  %v2301_v48 = vadd.f32 %v625_v35, %v511_v33  ;;  %v2311_v60 = vadd.f32 %v641_v41, %v575_v46 }
 0x156   : > { %723 = vadd.xlane.f32.xlu1 %v2261_v62  ;;  %717 = vadd.xlane.f32.xlu0 %v2247_v50  ;;  %v2274_v10 = vadd.f32 %v628_v3, %v522_v2  ;;  %v2281_v31 = vadd.f32 %v644_v6, %v586_v9  ;;  %v648_v63 = vunpack.c.h.bf16 %v2202_v19  ;;  %v646_v19 = vunpack.c.h.bf16 %v2192_v17 }
 0x157   : > { %v2299_v47 = vadd.f32 %v626_v15, %v514_v34  ;;  %v2309_v59 = vadd.f32 %v642_v40, %v578_v12  ;;  %v645_v9 = vunpack.c.l.bf16 %v2192_v17  ;;  %v636_v33 = vunpack.c.h.bf16 %v2214_v22 }
 0x158   : > { %v635_v17 = vunpack.c.l.bf16 %v2214_v22  ;;  %v634_v40 = vunpack.c.h.bf16 %v2205_v20  ;;  %v633_v22 = vunpack.c.l.bf16 %v2205_v20  ;;  %v650_v46 = vunpack.c.h.bf16 %v2208_v21 }
 0x159   : > { %v1627_v7 = vpop.f32.mrb[8].mxu0  ;;  %v1643_v8 = vpop.f32.mrb[8].mxu1  ;;  %v649_v12 = vunpack.c.l.bf16 %v2208_v21  ;;  %v652_v21 = vunpack.c.h.bf16 %v2218_v23 }
 0x15a   : > { %719 = vadd.xlane.f32.xlu1 %v2251_v51  ;;  %687 = vadd.xlane.f32.xlu0 %v2253_v52  ;;  %v526_v26 = vpop.f32.mrb[9].mxu0  ;;  %v590_v14 = vpop.f32.mrb[9].mxu1  ;;  %v535_v56 = vadd.f32 %v1627_v7, %v2225_v24  ;;  %v599_v61 = vadd.f32 %v1643_v8, %v2225_v24  ;;  %v630_v7 = vunpack.c.h.bf16 %v2189_v16  ;;  %v629_v8 = vunpack.c.l.bf16 %v2189_v16 }
 0x15b   : > { %v1628_v27 = vpop.f32.mrb[10].mxu0  ;;  %v1644_v28 = vpop.f32.mrb[10].mxu1  ;;  %v527_v5 = vadd.f32 %v2225_v24, %v526_v26  ;;  %v591_v25 = vadd.f32 %v2225_v24, %v590_v14 }
 0x15c   : > { %v529_v29 = vpop.f32.mrb[11].mxu0  ;;  %v593_v30 = vpop.f32.mrb[11].mxu1  ;;  %v538_v13 = vadd.f32 %v1628_v27, %v2225_v24  ;;  %v602_v0 = vadd.f32 %v1644_v28, %v2225_v24  ;;  %v2320_v2 = vadd.f32 %v631_v58, %v535_v56  ;;  %v2327_v4 = vadd.f32 %v647_v18, %v599_v61 }
 0x15d   : > { %v530_v6 = vadd.f32 %v2225_v24, %v529_v29  ;;  %v594_v27 = vadd.f32 %v2225_v24, %v593_v30  ;;  %v2341_v26 = vadd.f32 %v629_v8, %v527_v5  ;;  %v2351_v14 = vadd.f32 %v645_v9, %v591_v25 }
 0x15e   : > { %699 = vadd.xlane.f32.xlu1 %v2274_v10  ;;  %697 = vadd.xlane.f32.xlu0 %v2276_v11  ;;  %v2318_v1 = vadd.f32 %v632_v57, %v538_v13  ;;  %v2325_v3 = vadd.f32 %v648_v63, %v602_v0  ;;  %v651_v13 = vunpack.c.l.bf16 %v2218_v23 }
 0x15f   : > { %v2339_v28 = vadd.f32 %v630_v7, %v530_v6  ;;  %v2349_v34 = vadd.f32 %v646_v19, %v594_v27 }
 0x161   : > { %v1631_v36 = vpop.f32.mrb[12].mxu0  ;;  %v2289_v37 = vpop.f32.mrb[12].mxu1 }
 0x162   : > { %731 = vadd.xlane.f32.xlu1 %v2281_v31  ;;  %729 = vadd.xlane.f32.xlu0 %v2283_v32  ;;  %v542_v38 = vpop.f32.mrb[13].mxu0  ;;  %v606_v39 = vpop.f32.mrb[13].mxu1  ;;  %v551_v16 = vadd.f32 %v1631_v36, %v2225_v24 }
 0x163   : > { %v1632_v42 = vpop.f32.mrb[14].mxu0  ;;  %v2295_v43 = vpop.f32.mrb[14].mxu1  ;;  %v543_v35 = vadd.f32 %v2225_v24, %v542_v38  ;;  %v607_v41 = vadd.f32 %v2225_v24, %v606_v39  ;;  %v615_v39 = vadd.f32 %v2289_v37, %v2225_v24 }
 0x164   : > { %v545_v53 = vpop.f32.mrb[15].mxu0  ;;  %v609_v55 = vpop.f32.mrb[15].mxu1  ;;  %v554_v29 = vadd.f32 %v1632_v42, %v2225_v24  ;;  %v2357_v15 = vadd.f32 %v635_v17, %v551_v16 }
 0x165   : > { %v546_v36 = vadd.f32 %v2225_v24, %v545_v53  ;;  %v610_v42 = vadd.f32 %v2225_v24, %v609_v55  ;;  %v2371_v38 = vadd.f32 %v633_v22, %v543_v35  ;;  %v2377_v53 = vadd.f32 %v649_v12, %v607_v41 }
 0x166   : > { %695 = vadd.xlane.f32.xlu1 %v2299_v47  ;;  %693 = vadd.xlane.f32.xlu0 %v2301_v48  ;;  %v2355_v30 = vadd.f32 %v636_v33, %v554_v29  ;;  %v618_v55 = vadd.f32 %v2295_v43, %v2225_v24  ;;  %v2389_v58 = vadd.f32 %v651_v13, %v615_v39 }
 0x167   : > { %v2369_v56 = vadd.f32 %v634_v40, %v546_v36  ;;  %v2375_v20 = vadd.f32 %v650_v46, %v610_v42 }
 0x168   : > { %v2387_v57 = vadd.f32 %v652_v21, %v618_v55 }
 0x16a   : > { %727 = vadd.xlane.f32.xlu1 %v2309_v59  ;;  %725 = vadd.xlane.f32.xlu0 %v2311_v60 }
 0x16e   : > { %707 = vadd.xlane.f32.xlu1 %v2318_v1  ;;  %705 = vadd.xlane.f32.xlu0 %v2320_v2 }
 0x172   : > { %739 = vadd.xlane.f32.xlu1 %v2325_v3  ;;  %737 = vadd.xlane.f32.xlu0 %v2327_v4 }
 0x176   : > { %703 = vadd.xlane.f32.xlu1 %v2339_v28  ;;  %701 = vadd.xlane.f32.xlu0 %v2341_v26 }
 0x17a   : > { %735 = vadd.xlane.f32.xlu1 %v2349_v34  ;;  %733 = vadd.xlane.f32.xlu0 %v2351_v14 }
 0x17e   : > { %715 = vadd.xlane.f32.xlu1 %v2355_v30  ;;  %713 = vadd.xlane.f32.xlu0 %v2357_v15 }
 0x182   : > { %711 = vadd.xlane.f32.xlu1 %v2369_v56  ;;  %709 = vadd.xlane.f32.xlu0 %v2371_v38 }
 0x186   : > { %743 = vadd.xlane.f32.xlu1 %v2375_v20  ;;  %741 = vadd.xlane.f32.xlu0 %v2377_v53 }
 0x18a   : > { %747 = vadd.xlane.f32.xlu1 %v2387_v57  ;;  %745 = vadd.xlane.f32.xlu0 %v2389_v58 }
 0x1db   : > { %v722_v37 = vpop.xlane.xlu0 %721  ;;  %v690_v61 = vpop.xlane.xlu1 %689 }
 0x1dc   : > { %v768_v63 = vmul.f32 0.0078125, %v722_v37  ;;  %v752_v24 = vmul.f32 0.0078125, %v690_v61 }
 0x1de   : > { %v2394_v43 = vsub.f32 %v2240_v45, %v752_v24  ;;  %v2397_v18 = vsub.f32 %v2238_v44, %v768_v63 }
 0x1df   : > { %v692_v23 = vpop.xlane.xlu1 %691  ;;  %v686_v0 = vpop.xlane.xlu0 %685 }
 0x1e0   : > { %v753_v5 = vmul.f32 0.0078125, %v692_v23  ;;  %v750_v6 = vmul.f32 0.0078125, %v686_v0  ;;  %v816_v7 = vmul.f32 %v2394_v43, %v2394_v43  ;;  %v832_v16 = vmul.f32 %v2397_v18, %v2397_v18 }
 0x1e2   : > { %v2402_v8 = vsub.f32 %v2256_v54, %v753_v5  ;;  %850 = vadd.xlane.f32.xlu0 %v816_v7  ;;  %v2405_v19 = vsub.f32 %v2245_v49, %v750_v6 }
 0x1e3   : > { %v724_v9 = vpop.xlane.xlu1 %723  ;;  %v718_v45 = vpop.xlane.xlu0 %717 }
 0x1e4   : > { %v769_v25 = vmul.f32 0.0078125, %v724_v9  ;;  %v766_v27 = vmul.f32 0.0078125, %v718_v45  ;;  %v817_v44 = vmul.f32 %v2402_v8, %v2402_v8  ;;  %v814_v49 = vmul.f32 %v2405_v19, %v2405_v19 }
 0x1e6   : > { %v2412_v29 = vsub.f32 %v2261_v62, %v769_v25  ;;  %852 = vadd.xlane.f32.xlu1 %v817_v44  ;;  %882 = vadd.xlane.f32.xlu0 %v832_v16  ;;  %v2417_v17 = vsub.f32 %v2247_v50, %v766_v27 }
 0x1e7   : > { %v720_v54 = vpop.xlane.xlu1 %719  ;;  %v688_v33 = vpop.xlane.xlu0 %687 }
 0x1e8   : > { %v767_v35 = vmul.f32 0.0078125, %v720_v54  ;;  %v751_v36 = vmul.f32 0.0078125, %v688_v33  ;;  %v833_v40 = vmul.f32 %v2412_v29, %v2412_v29  ;;  %v830_v50 = vmul.f32 %v2417_v17, %v2417_v17 }
 0x1ea   : > { %v2422_v22 = vsub.f32 %v2253_v52, %v751_v36  ;;  %884 = vadd.xlane.f32.xlu1 %v833_v40  ;;  %846 = vadd.xlane.f32.xlu0 %v814_v49  ;;  %v2425_v62 = vsub.f32 %v2251_v51, %v767_v35 }
 0x1eb   : > { %v700_v41 = vpop.xlane.xlu1 %699  ;;  %v698_v42 = vpop.xlane.xlu0 %697 }
 0x1ec   : > { %v757_v46 = vmul.f32 0.0078125, %v700_v41  ;;  %v756_v12 = vmul.f32 0.0078125, %v698_v42  ;;  %v815_v39 = vmul.f32 %v2422_v22, %v2422_v22  ;;  %v831_v51 = vmul.f32 %v2425_v62, %v2425_v62 }
 0x1ee   : > { %v2432_v55 = vsub.f32 %v2276_v11, %v756_v12  ;;  %878 = vadd.xlane.f32.xlu0 %v830_v50  ;;  %848 = vadd.xlane.f32.xlu1 %v815_v39  ;;  %v2437_v13 = vsub.f32 %v2274_v10, %v757_v46 }
 0x1ef   : > { %v732_v52 = vpop.xlane.xlu1 %731  ;;  %v730_v21 = vpop.xlane.xlu0 %729 }
 0x1f0   : > { %v773_v37 = vmul.f32 0.0078125, %v732_v52  ;;  %v772_v61 = vmul.f32 0.0078125, %v730_v21  ;;  %v820_v63 = vmul.f32 %v2432_v55, %v2432_v55  ;;  %v821_v10 = vmul.f32 %v2437_v13, %v2437_v13 }
 0x1f2   : > { %v2442_v24 = vsub.f32 %v2283_v32, %v772_v61  ;;  %880 = vadd.xlane.f32.xlu1 %v831_v51  ;;  %858 = vadd.xlane.f32.xlu0 %v820_v63  ;;  %v2445_v11 = vsub.f32 %v2281_v31, %v773_v37 }
 0x1f3   : > { %v696_v23 = vpop.xlane.xlu1 %695  ;;  %v694_v0 = vpop.xlane.xlu0 %693 }
 0x1f4   : > { %v755_v5 = vmul.f32 0.0078125, %v696_v23  ;;  %v754_v6 = vmul.f32 0.0078125, %v694_v0  ;;  %v836_v7 = vmul.f32 %v2442_v24, %v2442_v24  ;;  %v837_v31 = vmul.f32 %v2445_v11, %v2445_v11 }
 0x1f6   : > { %v2452_v9 = vsub.f32 %v2301_v48, %v754_v6  ;;  %860 = vadd.xlane.f32.xlu1 %v821_v10  ;;  %890 = vadd.xlane.f32.xlu0 %v836_v7  ;;  %v2457_v25 = vsub.f32 %v2299_v47, %v755_v5 }
 0x1f7   : > { %v728_v32 = vpop.xlane.xlu1 %727  ;;  %v726_v45 = vpop.xlane.xlu0 %725 }
 0x1f8   : > { %v771_v27 = vmul.f32 0.0078125, %v728_v32  ;;  %v770_v44 = vmul.f32 0.0078125, %v726_v45  ;;  %v818_v16 = vmul.f32 %v2452_v9, %v2452_v9  ;;  %v819_v47 = vmul.f32 %v2457_v25, %v2457_v25 }
 0x1fa   : > { %v2462_v54 = vsub.f32 %v2311_v60, %v770_v44  ;;  %892 = vadd.xlane.f32.xlu1 %v837_v31  ;;  %854 = vadd.xlane.f32.xlu0 %v818_v16  ;;  %v2465_v48 = vsub.f32 %v2309_v59, %v771_v27 }
 0x1fb   : > { %v708_v33 = vpop.xlane.xlu1 %707  ;;  %v706_v49 = vpop.xlane.xlu0 %705 }
 0x1fc   : > { %v761_v35 = vmul.f32 0.0078125, %v708_v33  ;;  %v760_v36 = vmul.f32 0.0078125, %v706_v49  ;;  %v834_v40 = vmul.f32 %v2462_v54, %v2462_v54  ;;  %v835_v59 = vmul.f32 %v2465_v48, %v2465_v48 }
 0x1fe   : > { %v2472_v41 = vsub.f32 %v2320_v2, %v760_v36  ;;  %856 = vadd.xlane.f32.xlu1 %v819_v47  ;;  %886 = vadd.xlane.f32.xlu0 %v834_v40  ;;  %v2477_v46 = vsub.f32 %v2318_v1, %v761_v35 }
 0x1ff   : > { %v740_v60 = vpop.xlane.xlu1 %739  ;;  %v738_v42 = vpop.xlane.xlu0 %737 }
 0x200   : > { %v777_v12 = vmul.f32 0.0078125, %v740_v60  ;;  %v776_v50 = vmul.f32 0.0078125, %v738_v42  ;;  %v824_v39 = vmul.f32 %v2472_v41, %v2472_v41  ;;  %v825_v1 = vmul.f32 %v2477_v46, %v2477_v46 }
 0x202   : > { %v2482_v52 = vsub.f32 %v2327_v4, %v776_v50  ;;  %888 = vadd.xlane.f32.xlu1 %v835_v59  ;;  %866 = vadd.xlane.f32.xlu0 %v824_v39  ;;  %v2485_v2 = vsub.f32 %v2325_v3, %v777_v12 }
 0x203   : > { %v704_v21 = vpop.xlane.xlu1 %703  ;;  %v702_v51 = vpop.xlane.xlu0 %701 }
 0x204   : > { %v759_v37 = vmul.f32 0.0078125, %v704_v21  ;;  %v758_v61 = vmul.f32 0.0078125, %v702_v51  ;;  %v840_v63 = vmul.f32 %v2482_v52, %v2482_v52  ;;  %v841_v3 = vmul.f32 %v2485_v2, %v2485_v2 }
 0x206   : > { %v2492_v23 = vsub.f32 %v2341_v26, %v758_v61  ;;  %868 = vadd.xlane.f32.xlu1 %v825_v1  ;;  %898 = vadd.xlane.f32.xlu0 %v840_v63  ;;  %v2497_v5 = vsub.f32 %v2339_v28, %v759_v37 }
 0x207   : > { %v736_v4 = vpop.xlane.xlu1 %735  ;;  %v734_v0 = vpop.xlane.xlu0 %733 }
 0x208   : > { %v775_v6 = vmul.f32 0.0078125, %v736_v4  ;;  %v774_v10 = vmul.f32 0.0078125, %v734_v0  ;;  %v822_v7 = vmul.f32 %v2492_v23, %v2492_v23  ;;  %v823_v28 = vmul.f32 %v2497_v5, %v2497_v5 }
 0x20a   : > { %v2502_v32 = vsub.f32 %v2351_v14, %v774_v10  ;;  %900 = vadd.xlane.f32.xlu1 %v841_v3  ;;  %862 = vadd.xlane.f32.xlu0 %v822_v7  ;;  %v2505_v26 = vsub.f32 %v2349_v34, %v775_v6 }
 0x20b   : > { %v716_v45 = vpop.xlane.xlu1 %715  ;;  %v714_v31 = vpop.xlane.xlu0 %713 }
 0x20c   : > { %v765_v27 = vmul.f32 0.0078125, %v716_v45  ;;  %v764_v44 = vmul.f32 0.0078125, %v714_v31  ;;  %v838_v16 = vmul.f32 %v2502_v32, %v2502_v32  ;;  %v839_v34 = vmul.f32 %v2505_v26, %v2505_v26 }
 0x20e   : > { %v2512_v33 = vsub.f32 %v2357_v15, %v764_v44  ;;  %864 = vadd.xlane.f32.xlu1 %v823_v28  ;;  %894 = vadd.xlane.f32.xlu0 %v838_v16  ;;  %v2517_v35 = vsub.f32 %v2355_v30, %v765_v27 }
 0x20f   : > { %v712_v14 = vpop.xlane.xlu1 %711  ;;  %v710_v49 = vpop.xlane.xlu0 %709 }
 0x210   : > { %v763_v36 = vmul.f32 0.0078125, %v712_v14  ;;  %v762_v47 = vmul.f32 0.0078125, %v710_v49  ;;  %v828_v40 = vmul.f32 %v2512_v33, %v2512_v33  ;;  %v829_v30 = vmul.f32 %v2517_v35, %v2517_v35 }
 0x212   : > { %v2522_v60 = vsub.f32 %v2371_v38, %v762_v47  ;;  %896 = vadd.xlane.f32.xlu1 %v839_v34  ;;  %874 = vadd.xlane.f32.xlu0 %v828_v40  ;;  %v2525_v15 = vsub.f32 %v2369_v56, %v763_v36 }
 0x213   : > { %v744_v42 = vpop.xlane.xlu1 %743  ;;  %v742_v59 = vpop.xlane.xlu0 %741 }
 0x214   : > { %v779_v12 = vmul.f32 0.0078125, %v744_v42  ;;  %v778_v50 = vmul.f32 0.0078125, %v742_v59  ;;  %v826_v39 = vmul.f32 %v2522_v60, %v2522_v60  ;;  %v827_v56 = vmul.f32 %v2525_v15, %v2525_v15 }
 0x216   : > { %v2532_v21 = vsub.f32 %v2377_v53, %v778_v50  ;;  %876 = vadd.xlane.f32.xlu1 %v829_v30  ;;  %870 = vadd.xlane.f32.xlu0 %v826_v39  ;;  %v2537_v37 = vsub.f32 %v2375_v20, %v779_v12 }
 0x217   : > { %v748_v38 = vpop.xlane.xlu1 %747  ;;  %v746_v51 = vpop.xlane.xlu0 %745 }
 0x218   : > { %v781_v61 = vmul.f32 0.0078125, %v748_v38  ;;  %v780_v1 = vmul.f32 0.0078125, %v746_v51  ;;  %v842_v63 = vmul.f32 %v2532_v21, %v2532_v21  ;;  %v843_v0 = vmul.f32 %v2537_v37, %v2537_v37 }
 0x21a   : > { %v2542_v4 = vsub.f32 %v2389_v58, %v780_v1  ;;  %872 = vadd.xlane.f32.xlu1 %v827_v56  ;;  %902 = vadd.xlane.f32.xlu0 %v842_v63  ;;  %v2545_v53 = vsub.f32 %v2387_v57, %v781_v61  ;;  %v2557_v56 = vld [vmem:[%s2733_s3] ss:$0 sm:$0xff] }
 0x21c   : > { %v844_v20 = vmul.f32 %v2542_v4, %v2542_v4  ;;  %v845_v3 = vmul.f32 %v2545_v53, %v2545_v53 }
 0x21e   : > { %904 = vadd.xlane.f32.xlu1 %v843_v0  ;;  %906 = vadd.xlane.f32.xlu0 %v844_v20 }
 0x222   : > { %908 = vadd.xlane.f32.xlu1 %v845_v3 }
 0x26f   : > { %v851_v6 = vpop.xlane.xlu0 %850 }
 0x270   : > { %v912_v58 = vmul.f32 0.0078125, %v851_v6 }
 0x272   : > { %v944_v10 = vadd.f32 1e-05, %v912_v58 }
 0x273   : > { %v853_v7 = vpop.xlane.xlu1 %852  ;;  %v883_v45 = vpop.xlane.xlu0 %882 }
 0x274   : > { %1766 = vrsqrt.f32 %v944_v10  ;;  %v913_v57 = vmul.f32 0.0078125, %v853_v7  ;;  %v928_v31 = vmul.f32 0.0078125, %v883_v45  ;;  %v2564_v7 = vld [vmem:[%s2734_s4] ss:$0 sm:$0xff] }
 0x276   : > { %v945_v27 = vadd.f32 1e-05, %v913_v57  ;;  %v960_v44 = vadd.f32 1e-05, %v928_v31 }
 0x277   : > { %v885_v28 = vpop.xlane.xlu1 %884  ;;  %v847_v16 = vpop.xlane.xlu0 %846 }
 0x278   : > { %1768 = vrsqrt.f32 %v945_v27  ;;  %v929_v14 = vmul.f32 0.0078125, %v885_v28  ;;  %v910_v49 = vmul.f32 0.0078125, %v847_v16 }
 0x279   : > { %1770 = vrsqrt.f32 %v960_v44 }
 0x27a   : > { %v961_v34 = vadd.f32 1e-05, %v929_v14  ;;  %v942_v36 = vadd.f32 1e-05, %v910_v49 }
 0x27b   : > { %v849_v47 = vpop.xlane.xlu1 %848  ;;  %v879_v40 = vpop.xlane.xlu0 %878 }
 0x27c   : > { %1772 = vrsqrt.f32 %v961_v34  ;;  %v911_v42 = vmul.f32 0.0078125, %v849_v47  ;;  %v926_v59 = vmul.f32 0.0078125, %v879_v40 }
 0x27d   : > { %1774 = vrsqrt.f32 %v942_v36 }
 0x27e   : > { %v1767_v12 = vpop.eup %1766  ;;  %v943_v50 = vadd.f32 1e-05, %v911_v42  ;;  %v958_v30 = vadd.f32 1e-05, %v926_v59 }
 0x27f   : > { %v1008_v39 = vmul.f32 %v1767_v12, %v2394_v43  ;;  %v881_v38 = vpop.xlane.xlu1 %880  ;;  %v859_v51 = vpop.xlane.xlu0 %858 }
 0x280   : > { %1776 = vrsqrt.f32 %v943_v50  ;;  %v927_v61 = vmul.f32 0.0078125, %v881_v38  ;;  %v916_v1 = vmul.f32 0.0078125, %v859_v51 }
 0x281   : > { %1778 = vrsqrt.f32 %v958_v30  ;;  %v1047_v6 = vmul.f32 %v2557_v56, %v1008_v39 }
 0x282   : > { %v1769_v63 = vpop.eup %1768  ;;  %v959_v0 = vadd.f32 1e-05, %v927_v61  ;;  %v948_v20 = vadd.f32 1e-05, %v916_v1 }
 0x283   : > { %v1771_v3 = vpop.eup %1770  ;;  %v1009_v58 = vmul.f32 %v1769_v63, %v2402_v8  ;;  %v861_v43 = vpop.xlane.xlu1 %860  ;;  %v1086_v8 = vadd.f32 %v2564_v7, %v1047_v6 }
 0x284   : > { %v891_v10 = vpop.xlane.xlu0 %890  ;;  %v1024_v45 = vmul.f32 %v1771_v3, %v2397_v18  ;;  %1780 = vrsqrt.f32 %v959_v0  ;;  %v917_v57 = vmul.f32 0.0078125, %v861_v43 }
 0x285   : > { %v932_v31 = vmul.f32 0.0078125, %v891_v10  ;;  %v1048_v27 = vmul.f32 %v2557_v56, %v1009_v58  ;;  %1782 = vrsqrt.f32 %v948_v20 }
 0x286   : > { %v1773_v44 = vpop.eup %1772  ;;  %v949_v28 = vadd.f32 1e-05, %v917_v57  ;;  %v1063_v34 = vmul.f32 %v2557_v56, %v1024_v45 }
 0x287   : > { %v964_v16 = vadd.f32 1e-05, %v932_v31  ;;  %v1775_v14 = vpop.eup %1774  ;;  %v1087_v49 = vadd.f32 %v2564_v7, %v1048_v27  ;;  %v1025_v36 = vmul.f32 %v1773_v44, %v2412_v29  ;;  %v893_v18 = vpop.xlane.xlu1 %892 }
 0x288   : > { %v855_v47 = vpop.xlane.xlu0 %854  ;;  %v1006_v40 = vmul.f32 %v1775_v14, %v2405_v19  ;;  %1784 = vrsqrt.f32 %v949_v28  ;;  %v933_v42 = vmul.f32 0.0078125, %v893_v18  ;;  %v1102_v29 = vadd.f32 %v2564_v7, %v1063_v34 }
 0x289   : > { %v1490_v59 = vpack.c.bf16 %v1087_v49, %v1086_v8  ;;  %v1064_v12 = vmul.f32 %v2557_v56, %v1025_v36  ;;  %1786 = vrsqrt.f32 %v964_v16  ;;  %v914_v50 = vmul.f32 0.0078125, %v855_v47 }
 0x28a   : > { %v1777_v30 = vpop.eup %1776  ;;  %v1045_v39 = vmul.f32 %v2557_v56, %v1006_v40  ;;  %v965_v38 = vadd.f32 1e-05, %v933_v42 }
 0x28b   : > { %v1779_v51 = vpop.eup %1778  ;;  %1562 = vst [vmem:[%s2577_s15 + $0x8] sm:$0xff] %v1490_v59   ;;  %v1103_v19 = vadd.f32 %v2564_v7, %v1064_v12  ;;  %v1007_v61 = vmul.f32 %v1777_v30, %v2422_v22  ;;  %v946_v1 = vadd.f32 1e-05, %v914_v50  ;;  %v857_v63 = vpop.xlane.xlu1 %856 }
 0x28c   : > { %v887_v0 = vpop.xlane.xlu0 %886  ;;  %v1022_v20 = vmul.f32 %v1779_v51, %v2417_v17  ;;  %1788 = vrsqrt.f32 %v965_v38  ;;  %v915_v3 = vmul.f32 0.0078125, %v857_v63  ;;  %v1084_v45 = vadd.f32 %v2564_v7, %v1045_v39 }
 0x28d   : > { %v1530_v6 = vpack.c.bf16 %v1103_v19, %v1102_v29  ;;  %v1046_v58 = vmul.f32 %v2557_v56, %v1007_v61  ;;  %1790 = vrsqrt.f32 %v946_v1  ;;  %v930_v43 = vmul.f32 0.0078125, %v887_v0 }
 0x28e   : > { %v1781_v10 = vpop.eup %1780  ;;  %v947_v57 = vadd.f32 1e-05, %v915_v3  ;;  %v1061_v27 = vmul.f32 %v2557_v56, %v1022_v20 }
 0x28f   : > { %v1783_v31 = vpop.eup %1782  ;;  %1570 = vst [vmem:[%s2577_s15 + $0x48] sm:$0xff] %v1530_v6   ;;  %v1085_v22 = vadd.f32 %v2564_v7, %v1046_v58  ;;  %v1023_v17 = vmul.f32 %v1781_v10, %v2425_v62  ;;  %v962_v44 = vadd.f32 1e-05, %v930_v43  ;;  %v889_v28 = vpop.xlane.xlu1 %888 }
 0x290   : > { %v867_v16 = vpop.xlane.xlu0 %866  ;;  %v1012_v14 = vmul.f32 %v1783_v31, %v2432_v55  ;;  %1792 = vrsqrt.f32 %v947_v57  ;;  %v931_v8 = vmul.f32 0.0078125, %v889_v28  ;;  %v1100_v62 = vadd.f32 %v2564_v7, %v1061_v27 }
 0x291   : > { %v1485_v49 = vpack.c.bf16 %v1085_v22, %v1084_v45  ;;  %v1062_v34 = vmul.f32 %v2557_v56, %v1023_v17  ;;  %1794 = vrsqrt.f32 %v962_v44  ;;  %v920_v36 = vmul.f32 0.0078125, %v867_v16 }
 0x292   : > { %v1785_v18 = vpop.eup %1784  ;;  %v1051_v47 = vmul.f32 %v2557_v56, %v1012_v14  ;;  %v963_v40 = vadd.f32 1e-05, %v931_v8 }
 0x293   : > { %v1787_v42 = vpop.eup %1786  ;;  %1486 = vst [vmem:[%s2577_s15] sm:$0xff] %v1485_v49   ;;  %v1101_v59 = vadd.f32 %v2564_v7, %v1062_v34  ;;  %v1013_v55 = vmul.f32 %v1785_v18, %v2437_v13  ;;  %v952_v12 = vadd.f32 1e-05, %v920_v36  ;;  %v869_v50 = vpop.xlane.xlu1 %868 }
 0x294   : > { %v899_v30 = vpop.xlane.xlu0 %898  ;;  %v1028_v39 = vmul.f32 %v1787_v42, %v2442_v24  ;;  %1796 = vrsqrt.f32 %v963_v40  ;;  %v921_v38 = vmul.f32 0.0078125, %v869_v50  ;;  %v1090_v1 = vadd.f32 %v2564_v7, %v1051_v47 }
 0x295   : > { %v1525_v51 = vpack.c.bf16 %v1101_v59, %v1100_v62  ;;  %v1052_v29 = vmul.f32 %v2557_v56, %v1013_v55  ;;  %1798 = vrsqrt.f32 %v952_v12  ;;  %v936_v19 = vmul.f32 0.0078125, %v899_v30 }
 0x296   : > { %v1789_v61 = vpop.eup %1788  ;;  %v953_v63 = vadd.f32 1e-05, %v921_v38  ;;  %v1067_v20 = vmul.f32 %v2557_v56, %v1028_v39 }
 0x297   : > { %v1791_v0 = vpop.eup %1790  ;;  %1569 = vst [vmem:[%s2577_s15 + $0x40] sm:$0xff] %v1525_v51   ;;  %v1091_v13 = vadd.f32 %v2564_v7, %v1052_v29  ;;  %v1029_v24 = vmul.f32 %v1789_v61, %v2445_v11  ;;  %v968_v3 = vadd.f32 1e-05, %v936_v19  ;;  %v901_v6 = vpop.xlane.xlu1 %900 }
 0x298   : > { %v863_v58 = vpop.xlane.xlu0 %862  ;;  %v1010_v43 = vmul.f32 %v1791_v0, %v2452_v9  ;;  %1800 = vrsqrt.f32 %v953_v63  ;;  %v937_v10 = vmul.f32 0.0078125, %v901_v6  ;;  %v1106_v11 = vadd.f32 %v2564_v7, %v1067_v20 }
 0x299   : > { %v1500_v45 = vpack.c.bf16 %v1091_v13, %v1090_v1  ;;  %v1068_v57 = vmul.f32 %v2557_v56, %v1029_v24  ;;  %1802 = vrsqrt.f32 %v968_v3  ;;  %v918_v31 = vmul.f32 0.0078125, %v863_v58 }
 0x29a   : > { %v1793_v22 = vpop.eup %1792  ;;  %v1049_v27 = vmul.f32 %v2557_v56, %v1010_v43  ;;  %v969_v17 = vadd.f32 1e-05, %v937_v10 }
 0x29b   : > { %v1795_v44 = vpop.eup %1794  ;;  %1564 = vst [vmem:[%s2577_s15 + $0x18] sm:$0xff] %v1500_v45   ;;  %v1107_v28 = vadd.f32 %v2564_v7, %v1068_v57  ;;  %v1011_v9 = vmul.f32 %v1793_v22, %v2457_v25  ;;  %v950_v16 = vadd.f32 1e-05, %v918_v31  ;;  %v865_v14 = vpop.xlane.xlu1 %864 }
 0x29c   : > { %v895_v8 = vpop.xlane.xlu0 %894  ;;  %v1026_v49 = vmul.f32 %v1795_v44, %v2462_v54  ;;  %1804 = vrsqrt.f32 %v969_v17  ;;  %v919_v34 = vmul.f32 0.0078125, %v865_v14  ;;  %v1088_v42 = vadd.f32 %v2564_v7, %v1049_v27 }
 0x29d   : > { %v1540_v36 = vpack.c.bf16 %v1107_v28, %v1106_v11  ;;  %v1050_v18 = vmul.f32 %v2557_v56, %v1011_v9  ;;  %1806 = vrsqrt.f32 %v950_v16  ;;  %v934_v47 = vmul.f32 0.0078125, %v895_v8 }
 0x29e   : > { %v1797_v40 = vpop.eup %1796  ;;  %v951_v62 = vadd.f32 1e-05, %v919_v34  ;;  %v1065_v55 = vmul.f32 %v2557_v56, %v1026_v49 }
 0x29f   : > { %v1799_v59 = vpop.eup %1798  ;;  %1572 = vst [vmem:[%s2577_s15 + $0x58] sm:$0xff] %v1540_v36   ;;  %v1089_v25 = vadd.f32 %v2564_v7, %v1050_v18  ;;  %v1027_v54 = vmul.f32 %v1797_v40, %v2465_v48  ;;  %v966_v12 = vadd.f32 1e-05, %v934_v47  ;;  %v897_v50 = vpop.xlane.xlu1 %896 }
 0x2a0   : > { %v875_v30 = vpop.xlane.xlu0 %874  ;;  %v1016_v39 = vmul.f32 %v1799_v59, %v2472_v41  ;;  %1808 = vrsqrt.f32 %v951_v62  ;;  %v935_v38 = vmul.f32 0.0078125, %v897_v50  ;;  %v1104_v48 = vadd.f32 %v2564_v7, %v1065_v55 }
 0x2a1   : > { %v1495_v51 = vpack.c.bf16 %v1089_v25, %v1088_v42  ;;  %v1066_v29 = vmul.f32 %v2557_v56, %v1027_v54  ;;  %1810 = vrsqrt.f32 %v966_v12  ;;  %v924_v19 = vmul.f32 0.0078125, %v875_v30 }
 0x2a2   : > { %v1801_v61 = vpop.eup %1800  ;;  %v1055_v1 = vmul.f32 %v2557_v56, %v1016_v39  ;;  %v967_v63 = vadd.f32 1e-05, %v935_v38 }
 0x2a3   : > { %v1803_v0 = vpop.eup %1802  ;;  %1563 = vst [vmem:[%s2577_s15 + $0x10] sm:$0xff] %v1495_v51   ;;  %v1105_v13 = vadd.f32 %v2564_v7, %v1066_v29  ;;  %v1017_v41 = vmul.f32 %v1801_v61, %v2477_v46  ;;  %v956_v20 = vadd.f32 1e-05, %v924_v19  ;;  %v877_v24 = vpop.xlane.xlu1 %876 }
 0x2a4   : > { %v871_v3 = vpop.xlane.xlu0 %870  ;;  %v1032_v6 = vmul.f32 %v1803_v0, %v2482_v52  ;;  %1812 = vrsqrt.f32 %v967_v63  ;;  %v925_v58 = vmul.f32 0.0078125, %v877_v24  ;;  %v1094_v31 = vadd.f32 %v2564_v7, %v1055_v1 }
 0x2a5   : > { %v1535_v43 = vpack.c.bf16 %v1105_v13, %v1104_v48  ;;  %v1056_v10 = vmul.f32 %v2557_v56, %v1017_v41  ;;  %1814 = vrsqrt.f32 %v956_v20  ;;  %v922_v45 = vmul.f32 0.0078125, %v871_v3 }
 0x2a6   : > { %v1805_v57 = vpop.eup %1804  ;;  %v957_v22 = vadd.f32 1e-05, %v925_v58  ;;  %v1071_v17 = vmul.f32 %v2557_v56, %v1032_v6 }
 0x2a7   : > { %v1807_v27 = vpop.eup %1806  ;;  %1571 = vst [vmem:[%s2577_s15 + $0x50] sm:$0xff] %v1535_v43   ;;  %v1095_v46 = vadd.f32 %v2564_v7, %v1056_v10  ;;  %v1033_v52 = vmul.f32 %v1805_v57, %v2485_v2  ;;  %v954_v44 = vadd.f32 1e-05, %v922_v45  ;;  %v873_v11 = vpop.xlane.xlu1 %872 }
 0x2a8   : > { %v903_v28 = vpop.xlane.xlu0 %902  ;;  %v1014_v9 = vmul.f32 %v1807_v27, %v2492_v23  ;;  %1816 = vrsqrt.f32 %v957_v22  ;;  %v923_v16 = vmul.f32 0.0078125, %v873_v11  ;;  %v1110_v2 = vadd.f32 %v2564_v7, %v1071_v17 }
 0x2a9   : > { %v1510_v14 = vpack.c.bf16 %v1095_v46, %v1094_v31  ;;  %v1072_v8 = vmul.f32 %v2557_v56, %v1033_v52  ;;  %1818 = vrsqrt.f32 %v954_v44  ;;  %v938_v49 = vmul.f32 0.0078125, %v903_v28 }
 0x2aa   : > { %v1809_v34 = vpop.eup %1808  ;;  %v1053_v36 = vmul.f32 %v2557_v56, %v1014_v9  ;;  %v955_v18 = vadd.f32 1e-05, %v923_v16 }
 0x2ab   : > { %v1811_v47 = vpop.eup %1810  ;;  %1566 = vst [vmem:[%s2577_s15 + $0x28] sm:$0xff] %v1510_v14   ;;  %v1111_v40 = vadd.f32 %v2564_v7, %v1072_v8  ;;  %v1015_v23 = vmul.f32 %v1809_v34, %v2497_v5  ;;  %v970_v42 = vadd.f32 1e-05, %v938_v49  ;;  %v905_v62 = vpop.xlane.xlu1 %904 }
 0x2ac   : > { %v907_v59 = vpop.xlane.xlu0 %906  ;;  %v1030_v25 = vmul.f32 %v1811_v47, %v2502_v32  ;;  %1820 = vrsqrt.f32 %v955_v18  ;;  %v939_v55 = vmul.f32 0.0078125, %v905_v62  ;;  %v1092_v39 = vadd.f32 %v2564_v7, %v1053_v36 }
 0x2ad   : > { %v1550_v54 = vpack.c.bf16 %v1111_v40, %v1110_v2  ;;  %v1054_v12 = vmul.f32 %v2557_v56, %v1015_v23  ;;  %1822 = vrsqrt.f32 %v970_v42  ;;  %v940_v50 = vmul.f32 0.0078125, %v907_v59 }
 0x2ae   : > { %v1813_v30 = vpop.eup %1812  ;;  %v971_v38 = vadd.f32 1e-05, %v939_v55  ;;  %v1069_v29 = vmul.f32 %v2557_v56, %v1030_v25 }
 0x2af   : > { %v1815_v51 = vpop.eup %1814  ;;  %1574 = vst [vmem:[%s2577_s15 + $0x68] sm:$0xff] %v1550_v54   ;;  %v1093_v5 = vadd.f32 %v2564_v7, %v1054_v12  ;;  %v1031_v32 = vmul.f32 %v1813_v30, %v2505_v26  ;;  %v972_v19 = vadd.f32 1e-05, %v940_v50  ;;  %v909_v61 = vpop.xlane.xlu1 %908 }
 0x2b0   : > { %v1020_v1 = vmul.f32 %v1815_v51, %v2512_v33  ;;  %1824 = vrsqrt.f32 %v971_v38  ;;  %v941_v63 = vmul.f32 0.0078125, %v909_v61  ;;  %v1108_v24 = vadd.f32 %v2564_v7, %v1069_v29 }
 0x2b1   : > { %v1505_v0 = vpack.c.bf16 %v1093_v5, %v1092_v39  ;;  %v1070_v48 = vmul.f32 %v2557_v56, %v1031_v32  ;;  %1826 = vrsqrt.f32 %v972_v19 }
 0x2b2   : > { %v1817_v13 = vpop.eup %1816  ;;  %v973_v41 = vadd.f32 1e-05, %v941_v63  ;;  %v1059_v26 = vmul.f32 %v2557_v56, %v1020_v1 }
 0x2b3   : > { %v1819_v20 = vpop.eup %1818  ;;  %1565 = vst [vmem:[%s2577_s15 + $0x20] sm:$0xff] %v1505_v0   ;;  %v1109_v3 = vadd.f32 %v2564_v7, %v1070_v48  ;;  %v1021_v6 = vmul.f32 %v1817_v13, %v2517_v35 }
 0x2b4   : > { %v1018_v33 = vmul.f32 %v1819_v20, %v2522_v60  ;;  %1828 = vrsqrt.f32 %v973_v41  ;;  %v1098_v57 = vadd.f32 %v2564_v7, %v1059_v26 }
 0x2b5   : > { %v1545_v58 = vpack.c.bf16 %v1109_v3, %v1108_v24  ;;  %v1060_v43 = vmul.f32 %v2557_v56, %v1021_v6 }
 0x2b6   : > { %v1821_v10 = vpop.eup %1820  ;;  %v1057_v22 = vmul.f32 %v2557_v56, %v1018_v33 }
 0x2b7   : > { %v1823_v45 = vpop.eup %1822  ;;  %1573 = vst [vmem:[%s2577_s15 + $0x60] sm:$0xff] %v1545_v58   ;;  %v1099_v31 = vadd.f32 %v2564_v7, %v1060_v43  ;;  %v1019_v27 = vmul.f32 %v1821_v10, %v2525_v15 }
 0x2b8   : > { %v1034_v35 = vmul.f32 %v1823_v45, %v2532_v21  ;;  %v1096_v44 = vadd.f32 %v2564_v7, %v1057_v22 }
 0x2b9   : > { %v1520_v60 = vpack.c.bf16 %v1099_v31, %v1098_v57  ;;  %v1058_v46 = vmul.f32 %v2557_v56, %v1019_v27 }
 0x2ba   : > { %v1825_v17 = vpop.eup %1824  ;;  %v1073_v28 = vmul.f32 %v2557_v56, %v1034_v35 }
 0x2bb   : > { %v1827_v52 = vpop.eup %1826  ;;  %1568 = vst [vmem:[%s2577_s15 + $0x38] sm:$0xff] %v1520_v60   ;;  %v1097_v11 = vadd.f32 %v2564_v7, %v1058_v46  ;;  %v1035_v9 = vmul.f32 %v1825_v17, %v2537_v37 }
 0x2bc   : > { %v1036_v15 = vmul.f32 %v1827_v52, %v2542_v4  ;;  %v1112_v8 = vadd.f32 %v2564_v7, %v1073_v28 }
 0x2bd   : > { %v1515_v21 = vpack.c.bf16 %v1097_v11, %v1096_v44  ;;  %v1074_v16 = vmul.f32 %v2557_v56, %v1035_v9 }
 0x2be   : > { %v1829_v14 = vpop.eup %1828  ;;  %v1075_v34 = vmul.f32 %v2557_v56, %v1036_v15 }
 0x2bf   : > { %1567 = vst [vmem:[%s2577_s15 + $0x30] sm:$0xff] %v1515_v21   ;;  %v1113_v49 = vadd.f32 %v2564_v7, %v1074_v16  ;;  %v1037_v36 = vmul.f32 %v1829_v14, %v2545_v53 }
 0x2c0   : > { %v1114_v4 = vadd.f32 %v2564_v7, %v1075_v34 }
 0x2c1   : > { %v1555_v18 = vpack.c.bf16 %v1113_v49, %v1112_v8  ;;  %v1076_v37 = vmul.f32 %v2557_v56, %v1037_v36 }
 0x2c3   : > { %1575 = vst [vmem:[%s2577_s15 + $0x70] sm:$0xff] %v1555_v18   ;;  %v1115_v47 = vadd.f32 %v2564_v7, %v1076_v37 }
 0x2c5   : > { %v1560_v53 = vpack.c.bf16 %v1115_v47, %v1114_v4 }
 0x2c7   : > { %1576 = vst [vmem:[%s2577_s15 + $0x78] sm:$0xff] %v1560_v53  }
 0x2c8   : > { %1901 = shalt.err (!%p1898_p7)
}
 0x2c9   : > { %s1902_s26 = scalar_lea.hbm %s2683_s10, 2048  ;;  %s1906_s14 = scalar_lea.hbm %s2735_s5, 4096 }
 0x2ca   : > { %p1903_p9 = scmp.ne.s32.totalorder %s2683_s10, %s1902_s26  ;;  %p1907_p5 = scmp.lt.u32.totalorder %s2683_s10, %s2735_s5 }
 0x2cb   : > { %p1908_p11 = scmp.lt.u32.totalorder %s1906_s14, %s1902_s26  ;;  %p1910_p4 = scmp.lt.u32.totalorder %s1902_s26, %s2683_s10 }
 0x2cc   : > { %p1904_p1 = pnand %p1903_p9, %p2091_p12 }
 0x2cd   : > { %p1909_p2 = por %p1908_p11, %p1907_p5 }
 0x2ce   : > { %p1905_p0 = pneg %p1904_p1 }
 0x2cf   : > { %p1911_p6 = por %p1910_p4, %p1909_p2 }
 0x2d1   : > { %p1912_p8 = pnand %p1911_p6, %p1905_p0 }
 0x2d3   : > { %1915 = shalt.err (!%p1912_p8)
}
 0x2d4   : > { %s1965_s13 = smov 64   ;;  %s1966_s28 = smov 4  }
 0x2d5   : > { %1671 = dma.vmem_to_hbm [thread:$0]  (%p2091_p12), %s2685_s29, 2048, %s2683_s10, %s1277_s11, %s1965_s13, %s1965_s13, %s1966_s28  }
 0x2d6 PF: > { %s1305_s27 = sand.u32 1, %s1946_s18   ;;  %p2750_p10 = scmp.ne.s32.totalorder %s2740_s25, 0 }
 0x2d7   : > { %p2751_p13 = scmp.ge.s32.totalorder %s1958_s21, 2  ;;  %s1306_s22 = scalar_lea.sflag [#allocation4], %s1305_s27 }
 0x2d9   : > { %p1682_p3 = pnand %p2751_p13, %p2750_p10 }
 0x2db   : > { %1941 = dma.done.wait (!%p1682_p3), %s1306_s22, 2048  }
 0x2dc   : > { %1943 = vsyncadd (!%p1682_p3), %s1306_s22, 4294965248  ;;  %p19_p7 = scmp.ge.s32.totalorder %s2053_s30, 4   ;;  %s2752_s18 = smov %s1950_s19 }
 0x2dd   : > { %s2753_s19 = smov %s1954_s20  ;;  %s2754_s20 = smov %s2087_s8 }
 0x2de   : > { %s2755_s21 = smov %s2053_s30  ;;  %21 = sbr.rel (!%p19_p7) target bundleno = 6 (0x6), region = 89 }
 0x2e5   :  { %1311 = vsyncpa [#allocation3], 1 }
 0x2e6   :  { %1313 = vsyncpa [#allocation3 + $0x1], 1 }
 0x2e7   :  { %1314 = vsyncpa [#allocation6], 1 }
 0x2e8   :  { %1315 = vsyncpa [#allocation4], 1 }
 0x2e9   :  { %1317 = vsyncpa [#allocation4 + $0x1], 1 }

</bundles_post_ra>
